<compile_context>
chip_gen: v6e
topology: v6e:2x2x1
jax: 0.10.0
libtpu: 0.0.40
codegen_flags: <defaults>
</compile_context>

<pallas_src>
import functools

import jax
import jax.numpy as jnp
from jax.experimental import pallas as pl
from jax.experimental.pallas import tpu as pltpu


LANE = 128
SUB_BF16 = 16          # bf16 sublane tile -> keep packed-slab offsets 16-aligned
BF16 = jnp.bfloat16
F32 = jnp.float32


def _round_up(n, m):
    return ((n + m - 1) // m) * m


# ----------------------------- Pallas kernel ------------------------------ #

def _interaction_kernel(dims, xzg_ref, ze_ref, srt_ref, r_ref, w_ref, b_ref,
                        out_ref):
    """Single-invocation interaction-network forward.

    xzg_ref : (Mn, Np)  bf16  [x | z_node pad | z_global pad] per node row
    ze_ref  : (Me, Lp)  bf16  z_edge per edge row
    srt_ref : (Me, 2Mn) bf16  [sender one-hot | receiver one-hot] block-diag
    r_ref   : (Mn, Me)  bf16  receiver one-hot block-diag (scatter-add)
    w_ref   : (Rw, H)   bf16  packed weight slab (16-row aligned segments)
    b_ref   : (8, 128)  f32   packed bias slab
    out_ref : (Mn, 128) f32   lane-dense output; cols [0:2] are real
    """
    Np, Lp, H = dims["Np"], dims["Lp"], dims["H"]
    f32 = jnp.float32

    xzg = xzg_ref[...]
    ze = ze_ref[...]
    srt = srt_ref[...]
    r = r_ref[...]
    b = b_ref[...]

    # Static, sublane-aligned views into the packed weight slab.
    o = 0
    ws = w_ref[o:o + Np, :]; o += Np          # sender projection
    wr = w_ref[o:o + Np, :]; o += Np          # receiver projection
    wo = w_ref[o:o + Np, :]; o += Np          # object layer 1 (node|z_global part)
    w1c = w_ref[o:o + Lp, :]; o += Lp         # relational layer 1, z_edge part
    w2 = w_ref[o:o + H, :]; o += H
    w3 = w_ref[o:o + H, :]; o += H
    w4 = w_ref[o:o + H, :]; o += H            # effect proj, padded to 128 out lanes
    wo1c = w_ref[o:o + LANE, :]; o += LANE    # object layer 1, effects part
    wo2 = w_ref[o:o + H, :]                   # final proj, padded to 128 out lanes

    b1, b2, b3 = b[0:1, :], b[1:2, :], b[2:3, :]
    b4, bo1, bo2 = b[3:4, :], b[4:5, :], b[5:6, :]

    # --- relational model ---
    # Reassociated gather: project at node granularity, then one fused
    # [sender|receiver] block-diagonal one-hot gather dot.
    p_s = jnp.dot(xzg, ws, preferred_element_type=f32)          # [Mn, H]
    p_r = jnp.dot(xzg, wr, preferred_element_type=f32)          # [Mn, H]
    p_sr = jnp.concatenate([p_s, p_r], axis=0).astype(srt.dtype)  # [2Mn, H]

    h = (jnp.dot(srt, p_sr, preferred_element_type=f32)
         + jnp.dot(ze, w1c, preferred_element_type=f32)
         + b1)                                                    # [Me, H]
    h = jnp.maximum(h, 0.0)
    h = jnp.maximum(
        jnp.dot(h.astype(w2.dtype), w2, preferred_element_type=f32) + b2, 0.0)
    h = jnp.maximum(
        jnp.dot(h.astype(w3.dtype), w3, preferred_element_type=f32) + b3, 0.0)
    effects = jnp.maximum(
        jnp.dot(h.astype(w4.dtype), w4, preferred_element_type=f32) + b4, 0.0)
    # effects: [Me, 128], cols >= effect_dims are exactly zero.

    # Scatter-add of effects onto receiver nodes (block-diag one-hot matmul).
    eff_recv = jnp.dot(r, effects.astype(r.dtype),
                       preferred_element_type=f32)                # [Mn, 128]

    # --- object model ---
    g = (jnp.dot(xzg, wo, preferred_element_type=f32)
         + jnp.dot(eff_recv.astype(wo1c.dtype), wo1c,
                   preferred_element_type=f32)
         + bo1)                                                   # [Mn, H]
    g = jnp.maximum(g, 0.0)
    # wo2/bo2 padded to 128 lanes -> single unmasked lane-dense store.
    out_ref[...] = (jnp.dot(g.astype(wo2.dtype), wo2,
                            preferred_element_type=f32) + bo2)


# ------------------------ static operand packing --------------------------- #

def build_static_operands(params, edge_index, nodes, batch):
    """Builds the packed, padded, bf16 constants ONCE (hoisted out of the
    per-call path): one-hot relation matrices, kron block-diagonals, packed
    weight slab and bias slab."""
    D = params["w1a"].shape[0]            # node_dims (= 7 + latent)
    L = params["w1c"].shape[0]            # latent size
    E = params["w4"].shape[1]             # effect dims
    H = params["w2"].shape[0]             # hidden size
    assert H == LANE, "packed-slab layout assumes hidden_size == 128"
    edges = edge_index.shape[1]

    Dp = _round_up(D, SUB_BF16)
    Lp = _round_up(L, SUB_BF16)
    Np = Dp + Lp
    Mn, Me = batch * nodes, batch * edges

    row, col = edge_index[0], edge_index[1]
    ST = jax.nn.one_hot(row, nodes, dtype=F32)        # [edges, nodes] gather senders
    RT = jax.nn.one_hot(col, nodes, dtype=F32)        # [edges, nodes] gather receivers
    R = RT.T                                          # [nodes, edges] scatter-add

    eye = jnp.eye(batch, dtype=F32)
    srt_blk = jnp.concatenate(
        [jnp.kron(eye, ST), jnp.kron(eye, RT)], axis=1).astype(BF16)  # [Me, 2Mn]
    r_blk = jnp.kron(eye, R).astype(BF16)                             # [Mn, Me]

    def zpad(a, rows, cols):
        return jnp.pad(a, ((0, rows - a.shape[0]), (0, cols - a.shape[1])))

    ws = zpad(params["w1a"], Np, H)           # rows [0:D]=w1a, rest zero
    wr = zpad(params["w1b"], Np, H)
    wo = jnp.zeros((Np, H), F32)
    wo = wo.at[:D].set(params["wo1a"])        # x | z_node part
    wo = wo.at[Dp:Dp + L].set(params["wo1b"])  # z_global part
    w1c = zpad(params["w1c"], Lp, H)
    w4 = zpad(params["w4"], H, LANE)          # effect cols padded to 128 lanes
    wo1c = zpad(params["wo1c"], LANE, H)      # rows >= E are zero
    wo2 = zpad(params["wo2"], H, LANE)        # 2 real output lanes

    w_slab = jnp.concatenate(
        [ws, wr, wo, w1c, params["w2"], params["w3"], w4, wo1c, wo2],
        axis=0).astype(BF16)                  # [3*Np + Lp + 5*128, 128]

    def bpad(a):
        return zpad(a, 1, LANE)

    b_slab = jnp.concatenate(
        [bpad(params["b1"]), bpad(params["b2"]), bpad(params["b3"]),
         bpad(params["b4"]), bpad(params["bo1"]), bpad(params["bo2"]),
         jnp.zeros((2, LANE), F32)], axis=0)  # [8, 128] f32

    dims = dict(D=D, L=L, E=E, H=H, Dp=Dp, Lp=Lp, Np=Np,
                nodes=nodes, edges=edges, Mn=Mn, Me=Me)
    return (srt_blk, r_blk, w_slab, b_slab), dims


# ------------------------------ pallas wrapper ------------------------------ #

def build_pallas_forward(static_ops, dims, bs, steps):
    srt_blk, r_blk, w_slab, b_slab = static_ops
    nodes, edges = dims["nodes"], dims["edges"]
    D, L, H = dims["D"], dims["L"], dims["H"]
    Dp, Lp, Np = dims["Dp"], dims["Lp"], dims["Np"]
    Mn, Me = dims["Mn"], dims["Me"]
    B = bs * steps

    kernel = functools.partial(_interaction_kernel,
                               dict(Np=Np, Lp=Lp, H=H))

    def _full(shape):
        return pl.BlockSpec(shape, lambda g: (0, 0))

    in_shapes = [(Mn, Np), (Me, Lp), tuple(srt_blk.shape), tuple(r_blk.shape),
                 tuple(w_slab.shape), tuple(b_slab.shape)]

    grid_spec = pltpu.PrefetchScalarGridSpec(
        num_scalar_prefetch=0,
        grid=(1,),    # single step: latency-bound workload, no TC split
        in_specs=[_full(s) for s in in_shapes],
        out_specs=_full((Mn, LANE)),
    )

    pc = pl.pallas_call(
        kernel,
        out_shape=jax.ShapeDtypeStruct((Mn, LANE), F32),
        grid_spec=grid_spec,
        compiler_params=pltpu.CompilerParams(
            dimension_semantics=("arbitrary",)),
    )

    @jax.jit
    def forward(x, z_node, z_edge, z_global):
        # Per-call prep only (static operands were packed once above).
        z_node_r = jnp.broadcast_to(z_node[:, None], (bs, steps, nodes, L))
        x_cat = jnp.concatenate([x, z_node_r], axis=-1).reshape(B, nodes, D)
        # TODO(synk): torch's steps-major repeat pairs sample i's node features
        #             with another sample's z_edge/z_global when bs > 1;
        #             preserved verbatim from the PyTorch module.
        z_edge_r = jnp.tile(z_edge, (steps, 1, 1))                  # [B, edges, L]
        z_glob_r = jnp.tile(z_global[:, None, :], (steps, nodes, 1))  # [B, nodes, L]

        xzg = jnp.concatenate(
            [jnp.pad(x_cat, ((0, 0), (0, 0), (0, Dp - D))),
             jnp.pad(z_glob_r, ((0, 0), (0, 0), (0, Lp - L)))],
            axis=-1).reshape(Mn, Np).astype(BF16)
        ze = jnp.pad(z_edge_r, ((0, 0), (0, 0), (0, Lp - L))
                     ).reshape(Me, Lp).astype(BF16)

        out = pc(xzg, ze, srt_blk, r_blk, w_slab, b_slab)
        return out[:, :2].reshape(bs, steps, nodes, 2)

    return forward


# ------------------------- parameters (deterministic) ---------------------- #

def _linear_init(key, fan_in, fan_out):
    # torch.nn.Linear default init; weight stored [in, out] so x @ W + b.
    kw, kb = jax.random.split(key)
    bound = 1.0 / jnp.sqrt(jnp.float32(fan_in))
    w = jax.random.uniform(kw, (fan_in, fan_out), jnp.float32, -bound, bound)
    b = jax.random.uniform(kb, (1, fan_out), jnp.float32, -bound, bound)
    return w, b


def init_params(key, node_dims, latent_size, effect_dims, hidden_size):
    keys = jax.random.split(key, 6)
    rel_in = 2 * node_dims + latent_size
    obj_in = node_dims + effect_dims + latent_size

    w1, b1 = _linear_init(keys[0], rel_in, hidden_size)
    w2, b2 = _linear_init(keys[1], hidden_size, hidden_size)
    w3, b3 = _linear_init(keys[2], hidden_size, hidden_size)
    w4, b4 = _linear_init(keys[3], hidden_size, effect_dims)
    wo1, bo1 = _linear_init(keys[4], obj_in, hidden_size)
    wo2, bo2 = _linear_init(keys[5], hidden_size, 2)

    D, L = node_dims, latent_size
    return {
        # relational Linear1 split: [senders | receivers | z_edge]
        "w1a": w1[:D], "w1b": w1[D:2 * D], "w1c": w1[2 * D:], "b1": b1,
        "w2": w2, "b2": b2, "w3": w3, "b3": b3, "w4": w4, "b4": b4,
        # object Linear1 split: [x | z_global | effect_receivers]
        "wo1a": wo1[:D], "wo1b": wo1[D:D + L], "wo1c": wo1[D + L:], "bo1": bo1,
        "wo2": wo2, "bo2": bo2,
        # full versions kept for the exact pure-JAX reference
        "_w1_full": w1, "_wo1_full": wo1,
    }


# ------------------------------ references --------------------------------- #

def _prepare_inputs(x, z, edge_index):
    """Replicates the torch repeat/cat ordering of the module exactly."""
    z_node, z_edge, z_global = z
    bs, steps, nodes, _ = x.shape
    L = z_node.shape[-1]
    row, col = edge_index[0], edge_index[1]
    ST = jax.nn.one_hot(row, nodes, dtype=F32)          # [edges, nodes]
    RT = jax.nn.one_hot(col, nodes, dtype=F32)          # [edges, nodes]
    R = RT.T                                            # [nodes, edges]
    z_node_r = jnp.broadcast_to(z_node[:, None], (bs, steps, nodes, L))
    x_cat = jnp.concatenate([x, z_node_r], axis=-1).reshape(bs * steps, nodes, -1)
    z_edge_r = jnp.tile(z_edge, (steps, 1, 1))
    z_glob_r = jnp.tile(z_global[:, None, :], (steps, nodes, 1))
    return x_cat, z_edge_r, z_glob_r, ST, RT, R


def matched_reference_forward(params, x, z, edge_index):
    """Pure-JAX replica of the exact kernel math (bf16 MXU operands, f32
    accumulation, reassociated gather) for tight verification."""
    bs, steps, nodes, _ = x.shape
    x_cat, z_edge_r, z_glob_r, ST, RT, R = _prepare_inputs(x, z, edge_index)
    relu = jax.nn.relu

    def bdot(a, b):
        return jnp.einsum("...k,kn->...n", a.astype(BF16), b.astype(BF16),
                          preferred_element_type=F32)

    p_s = bdot(x_cat, params["w1a"])
    p_r = bdot(x_cat, params["w1b"])
    h = (jnp.einsum("en,bnh->beh", ST.astype(BF16), p_s.astype(BF16),
                    preferred_element_type=F32)
         + jnp.einsum("en,bnh->beh", RT.astype(BF16), p_r.astype(BF16),
                      preferred_element_type=F32)
         + bdot(z_edge_r, params["w1c"]) + params["b1"])
    h = relu(h)
    h = relu(bdot(h, params["w2"]) + params["b2"])
    h = relu(bdot(h, params["w3"]) + params["b3"])
    effects = relu(bdot(h, params["w4"]) + params["b4"])
    eff_recv = jnp.einsum("ne,bef->bnf", R.astype(BF16), effects.astype(BF16),
                          preferred_element_type=F32)
    g = relu(bdot(x_cat, params["wo1a"]) + bdot(z_glob_r, params["wo1b"])
             + bdot(eff_recv, params["wo1c"]) + params["bo1"])
    out = bdot(g, params["wo2"]) + params["bo2"]
    return out.reshape(bs, steps, nodes, 2)


def reference_forward(params, x, z, edge_index):
    """Exact float32 pure-JAX replica of the PyTorch module."""
    bs, steps, nodes, _ = x.shape
    x_cat, z_edge_r, z_glob_r, ST, RT, R = _prepare_inputs(x, z, edge_index)
    relu = jax.nn.relu

    senders = jnp.einsum("en,bnd->bed", ST, x_cat)
    receivers = jnp.einsum("en,bnd->bed", RT, x_cat)
    rel_in = jnp.concatenate([senders, receivers, z_edge_r], axis=-1)
    h = relu(rel_in @ params["_w1_full"] + params["b1"])
    h = relu(h @ params["w2"] + params["b2"])
    h = relu(h @ params["w3"] + params["b3"])
    effects = relu(h @ params["w4"] + params["b4"])
    eff_recv = jnp.einsum("ne,bef->bnf", R, effects)
    obj_in = jnp.concatenate([x_cat, z_glob_r, eff_recv], axis=-1)
    g = relu(obj_in @ params["_wo1_full"] + params["bo1"])
    out = g @ params["wo2"] + params["bo2"]
    return out.reshape(bs, steps, nodes, 2)


# ---------------------------------- main ----------------------------------- #

if __name__ == "__main__":
    bs, steps, nodes = 2, 3, 8
    latent_size = 2
    effect_dims = 4
    hidden_size = 128
    node_feat = 7                          # module expects x feat = 7
    node_dims = node_feat + latent_size    # = 9

    key = jax.random.PRNGKey(0)
    k_x, k_zn, k_ze, k_zg, k_p = jax.random.split(key, 5)

    # bidirectional ring graph -> both rows of edge_index cover nodes 0..nodes-1
    fwd = jnp.arange(nodes, dtype=jnp.int32)
    bwd = (fwd + 1) % nodes
    edge_index = jnp.stack([jnp.concatenate([fwd, bwd]),
                            jnp.concatenate([bwd, fwd])], axis=0)   # [2, 16]
    edges = edge_index.shape[1]

    x = jax.random.normal(k_x, (bs, steps, nodes, node_feat), jnp.float32)
    z_node = jax.random.normal(k_zn, (bs, nodes, latent_size), jnp.float32)
    z_edge = jax.random.normal(k_ze, (bs, edges, latent_size), jnp.float32)
    z_global = jax.random.normal(k_zg, (bs, latent_size), jnp.float32)
    z = (z_node, z_edge, z_global)

    params = init_params(k_p, node_dims, latent_size, effect_dims, hidden_size)

    # Static prep (one-hots, kron block-diags, weight packing) done once here.
    static_ops, dims = build_static_operands(params, edge_index, nodes,
                                             batch=bs * steps)
    forward = build_pallas_forward(static_ops, dims, bs, steps)

    out = forward(x, z_node, z_edge, z_global)
    out = jax.block_until_ready(out)
    assert out.shape == (bs, steps, nodes, 2), out.shape

    with jax.default_matmul_precision("float32"):
        ref_matched = matched_reference_forward(params, x, z, edge_index)
        ref_exact = reference_forward(params, x, z, edge_index)

    # Tight check: kernel implements its algorithm (incl. bf16 casts) exactly.
    err_m = float(jnp.max(jnp.abs(out - ref_matched)))
    assert jnp.allclose(out, ref_matched, atol=5e-3, rtol=5e-3), err_m
    # Loose sanity check vs. the exact f32 PyTorch-equivalent reference
    # (difference is only the intentional bf16 MXU-operand casts).
    err_e = float(jnp.max(jnp.abs(out - ref_exact)))
    assert jnp.allclose(out, ref_exact, atol=2.5e-1, rtol=1e-1), err_e

    print("KERNEL_OK")
</pallas_src>

<mosaic_0001>
module attributes {stable_mosaic.version = 11 : i64} {
  func.func @_interaction_kernel(%arg0: i32, %arg1: memref<48x32xbf16, #tpu.memory_space<vmem>>, %arg2: memref<96x16xbf16, #tpu.memory_space<vmem>>, %arg3: memref<96x96xbf16, #tpu.memory_space<vmem>>, %arg4: memref<48x96xbf16, #tpu.memory_space<vmem>>, %arg5: memref<752x128xbf16, #tpu.memory_space<vmem>>, %arg6: memref<8x128xf32, #tpu.memory_space<vmem>>, %arg7: memref<48x128xf32, #tpu.memory_space<vmem>>) attributes {dimension_semantics = [#tpu.dimension_semantics<arbitrary>], iteration_bounds = array<i64: 1>, scalar_prefetch = 0 : i64, scratch_operands = 0 : i64, tpu.core_type = #tpu.core_type<tc>, window_params = [{pipeline_mode = #tpu.pipeline_mode<synchronous>, transform_indices = @transform_0, window_bounds = array<i64: 48, 32>}, {pipeline_mode = #tpu.pipeline_mode<synchronous>, transform_indices = @transform_1, window_bounds = array<i64: 96, 16>}, {pipeline_mode = #tpu.pipeline_mode<synchronous>, transform_indices = @transform_2, window_bounds = array<i64: 96, 96>}, {pipeline_mode = #tpu.pipeline_mode<synchronous>, transform_indices = @transform_3, window_bounds = array<i64: 48, 96>}, {pipeline_mode = #tpu.pipeline_mode<synchronous>, transform_indices = @transform_4, window_bounds = array<i64: 752, 128>}, {pipeline_mode = #tpu.pipeline_mode<synchronous>, transform_indices = @transform_5, window_bounds = array<i64: 8, 128>}, {pipeline_mode = #tpu.pipeline_mode<synchronous>, transform_indices = @transform_6, window_bounds = array<i64: 48, 128>}]} {
    %c0 = arith.constant 0 : index
    %c0_0 = arith.constant 0 : index
    %0 = vector.load %arg1[%c0, %c0_0] : memref<48x32xbf16, #tpu.memory_space<vmem>>, vector<48x32xbf16>
    %c0_1 = arith.constant 0 : index
    %c0_2 = arith.constant 0 : index
    %1 = vector.load %arg2[%c0_1, %c0_2] : memref<96x16xbf16, #tpu.memory_space<vmem>>, vector<96x16xbf16>
    %c0_3 = arith.constant 0 : index
    %c0_4 = arith.constant 0 : index
    %2 = vector.load %arg3[%c0_3, %c0_4] : memref<96x96xbf16, #tpu.memory_space<vmem>>, vector<96x96xbf16>
    %c0_5 = arith.constant 0 : index
    %c0_6 = arith.constant 0 : index
    %3 = vector.load %arg4[%c0_5, %c0_6] : memref<48x96xbf16, #tpu.memory_space<vmem>>, vector<48x96xbf16>
    %c0_7 = arith.constant 0 : index
    %c0_8 = arith.constant 0 : index
    %4 = vector.load %arg6[%c0_7, %c0_8] : memref<8x128xf32, #tpu.memory_space<vmem>>, vector<8x128xf32>
    %c0_9 = arith.constant 0 : index
    %c0_10 = arith.constant 0 : index
    %5 = vector.load %arg5[%c0_9, %c0_10] : memref<752x128xbf16, #tpu.memory_space<vmem>>, vector<32x128xbf16>
    %c32 = arith.constant 32 : index
    %c0_11 = arith.constant 0 : index
    %6 = vector.load %arg5[%c32, %c0_11] : memref<752x128xbf16, #tpu.memory_space<vmem>>, vector<32x128xbf16>
    %c64 = arith.constant 64 : index
    %c0_12 = arith.constant 0 : index
    %7 = vector.load %arg5[%c64, %c0_12] : memref<752x128xbf16, #tpu.memory_space<vmem>>, vector<32x128xbf16>
    %c96 = arith.constant 96 : index
    %c0_13 = arith.constant 0 : index
    %8 = vector.load %arg5[%c96, %c0_13] : memref<752x128xbf16, #tpu.memory_space<vmem>>, vector<16x128xbf16>
    %c112 = arith.constant 112 : index
    %c0_14 = arith.constant 0 : index
    %9 = vector.load %arg5[%c112, %c0_14] : memref<752x128xbf16, #tpu.memory_space<vmem>>, vector<128x128xbf16>
    %c240 = arith.constant 240 : index
    %c0_15 = arith.constant 0 : index
    %10 = vector.load %arg5[%c240, %c0_15] : memref<752x128xbf16, #tpu.memory_space<vmem>>, vector<128x128xbf16>
    %c368 = arith.constant 368 : index
    %c0_16 = arith.constant 0 : index
    %11 = vector.load %arg5[%c368, %c0_16] : memref<752x128xbf16, #tpu.memory_space<vmem>>, vector<128x128xbf16>
    %c496 = arith.constant 496 : index
    %c0_17 = arith.constant 0 : index
    %12 = vector.load %arg5[%c496, %c0_17] : memref<752x128xbf16, #tpu.memory_space<vmem>>, vector<128x128xbf16>
    %c624 = arith.constant 624 : index
    %c0_18 = arith.constant 0 : index
    %13 = vector.load %arg5[%c624, %c0_18] : memref<752x128xbf16, #tpu.memory_space<vmem>>, vector<128x128xbf16>
    %14 = vector.extract_strided_slice %4 {offsets = [0, 0], sizes = [1, 128], strides = [1, 1]} : vector<8x128xf32> to vector<1x128xf32>
    %15 = vector.extract_strided_slice %4 {offsets = [1, 0], sizes = [1, 128], strides = [1, 1]} : vector<8x128xf32> to vector<1x128xf32>
    %16 = vector.extract_strided_slice %4 {offsets = [2, 0], sizes = [1, 128], strides = [1, 1]} : vector<8x128xf32> to vector<1x128xf32>
    %17 = vector.extract_strided_slice %4 {offsets = [3, 0], sizes = [1, 128], strides = [1, 1]} : vector<8x128xf32> to vector<1x128xf32>
    %18 = vector.extract_strided_slice %4 {offsets = [4, 0], sizes = [1, 128], strides = [1, 1]} : vector<8x128xf32> to vector<1x128xf32>
    %19 = vector.extract_strided_slice %4 {offsets = [5, 0], sizes = [1, 128], strides = [1, 1]} : vector<8x128xf32> to vector<1x128xf32>
    %cst = arith.constant dense<0.000000e+00> : vector<48x128xf32>
    %20 = tpu.matmul %0, %5, %cst {dimension_numbers = #tpu.dot_dimension_numbers<[1], [0], [0], [1], [0, 0, 1, 1], [], []>} : vector<48x32xbf16>, vector<32x128xbf16>, vector<48x128xf32> -> vector<48x128xf32>
    %cst_19 = arith.constant dense<0.000000e+00> : vector<48x128xf32>
    %21 = tpu.matmul %0, %6, %cst_19 {dimension_numbers = #tpu.dot_dimension_numbers<[1], [0], [0], [1], [0, 0, 1, 1], [], []>} : vector<48x32xbf16>, vector<32x128xbf16>, vector<48x128xf32> -> vector<48x128xf32>
    %22 = tpu.concatenate %20, %21 in 0 : vector<48x128xf32>, vector<48x128xf32> -> vector<96x128xf32>
    %23 = arith.truncf %22 : vector<96x128xf32> to vector<96x128xbf16>
    %cst_20 = arith.constant dense<0.000000e+00> : vector<96x128xf32>
    %24 = tpu.matmul %2, %23, %cst_20 {dimension_numbers = #tpu.dot_dimension_numbers<[1], [0], [0], [1], [0, 0, 1, 1], [], []>} : vector<96x96xbf16>, vector<96x128xbf16>, vector<96x128xf32> -> vector<96x128xf32>
    %cst_21 = arith.constant dense<0.000000e+00> : vector<96x128xf32>
    %25 = tpu.matmul %1, %8, %cst_21 {dimension_numbers = #tpu.dot_dimension_numbers<[1], [0], [0], [1], [0, 0, 1, 1], [], []>} : vector<96x16xbf16>, vector<16x128xbf16>, vector<96x128xf32> -> vector<96x128xf32>
    %26 = arith.addf %24, %25 : vector<96x128xf32>
    %27 = vector.broadcast %14 : vector<1x128xf32> to vector<96x128xf32>
    %28 = arith.addf %26, %27 : vector<96x128xf32>
    %cst_22 = arith.constant 0.000000e+00 : f32
    %29 = vector.broadcast %cst_22 : f32 to vector<96x128xf32>
    %30 = arith.maximumf %28, %29 : vector<96x128xf32>
    %31 = arith.truncf %30 : vector<96x128xf32> to vector<96x128xbf16>
    %cst_23 = arith.constant dense<0.000000e+00> : vector<96x128xf32>
    %32 = tpu.matmul %31, %9, %cst_23 {dimension_numbers = #tpu.dot_dimension_numbers<[1], [0], [0], [1], [0, 0, 1, 1], [], []>} : vector<96x128xbf16>, vector<128x128xbf16>, vector<96x128xf32> -> vector<96x128xf32>
    %33 = vector.broadcast %15 : vector<1x128xf32> to vector<96x128xf32>
    %34 = arith.addf %32, %33 : vector<96x128xf32>
    %cst_24 = arith.constant 0.000000e+00 : f32
    %35 = vector.broadcast %cst_24 : f32 to vector<96x128xf32>
    %36 = arith.maximumf %34, %35 : vector<96x128xf32>
    %37 = arith.truncf %36 : vector<96x128xf32> to vector<96x128xbf16>
    %cst_25 = arith.constant dense<0.000000e+00> : vector<96x128xf32>
    %38 = tpu.matmul %37, %10, %cst_25 {dimension_numbers = #tpu.dot_dimension_numbers<[1], [0], [0], [1], [0, 0, 1, 1], [], []>} : vector<96x128xbf16>, vector<128x128xbf16>, vector<96x128xf32> -> vector<96x128xf32>
    %39 = vector.broadcast %16 : vector<1x128xf32> to vector<96x128xf32>
    %40 = arith.addf %38, %39 : vector<96x128xf32>
    %cst_26 = arith.constant 0.000000e+00 : f32
    %41 = vector.broadcast %cst_26 : f32 to vector<96x128xf32>
    %42 = arith.maximumf %40, %41 : vector<96x128xf32>
    %43 = arith.truncf %42 : vector<96x128xf32> to vector<96x128xbf16>
    %cst_27 = arith.constant dense<0.000000e+00> : vector<96x128xf32>
    %44 = tpu.matmul %43, %11, %cst_27 {dimension_numbers = #tpu.dot_dimension_numbers<[1], [0], [0], [1], [0, 0, 1, 1], [], []>} : vector<96x128xbf16>, vector<128x128xbf16>, vector<96x128xf32> -> vector<96x128xf32>
    %45 = vector.broadcast %17 : vector<1x128xf32> to vector<96x128xf32>
    %46 = arith.addf %44, %45 : vector<96x128xf32>
    %cst_28 = arith.constant 0.000000e+00 : f32
    %47 = vector.broadcast %cst_28 : f32 to vector<96x128xf32>
    %48 = arith.maximumf %46, %47 : vector<96x128xf32>
    %49 = arith.truncf %48 : vector<96x128xf32> to vector<96x128xbf16>
    %cst_29 = arith.constant dense<0.000000e+00> : vector<48x128xf32>
    %50 = tpu.matmul %3, %49, %cst_29 {dimension_numbers = #tpu.dot_dimension_numbers<[1], [0], [0], [1], [0, 0, 1, 1], [], []>} : vector<48x96xbf16>, vector<96x128xbf16>, vector<48x128xf32> -> vector<48x128xf32>
    %cst_30 = arith.constant dense<0.000000e+00> : vector<48x128xf32>
    %51 = tpu.matmul %0, %7, %cst_30 {dimension_numbers = #tpu.dot_dimension_numbers<[1], [0], [0], [1], [0, 0, 1, 1], [], []>} : vector<48x32xbf16>, vector<32x128xbf16>, vector<48x128xf32> -> vector<48x128xf32>
    %52 = arith.truncf %50 : vector<48x128xf32> to vector<48x128xbf16>
    %cst_31 = arith.constant dense<0.000000e+00> : vector<48x128xf32>
    %53 = tpu.matmul %52, %12, %cst_31 {dimension_numbers = #tpu.dot_dimension_numbers<[1], [0], [0], [1], [0, 0, 1, 1], [], []>} : vector<48x128xbf16>, vector<128x128xbf16>, vector<48x128xf32> -> vector<48x128xf32>
    %54 = arith.addf %51, %53 : vector<48x128xf32>
    %55 = vector.broadcast %18 : vector<1x128xf32> to vector<48x128xf32>
    %56 = arith.addf %54, %55 : vector<48x128xf32>
    %cst_32 = arith.constant 0.000000e+00 : f32
    %57 = vector.broadcast %cst_32 : f32 to vector<48x128xf32>
    %58 = arith.maximumf %56, %57 : vector<48x128xf32>
    %59 = arith.truncf %58 : vector<48x128xf32> to vector<48x128xbf16>
    %cst_33 = arith.constant dense<0.000000e+00> : vector<48x128xf32>
    %60 = tpu.matmul %59, %13, %cst_33 {dimension_numbers = #tpu.dot_dimension_numbers<[1], [0], [0], [1], [0, 0, 1, 1], [], []>} : vector<48x128xbf16>, vector<128x128xbf16>, vector<48x128xf32> -> vector<48x128xf32>
    %61 = vector.broadcast %19 : vector<1x128xf32> to vector<48x128xf32>
    %62 = arith.addf %60, %61 : vector<48x128xf32>
    %c0_34 = arith.constant 0 : index
    %c0_35 = arith.constant 0 : index
    %63 = vector.load %arg7[%c0_34, %c0_35] : memref<48x128xf32, #tpu.memory_space<vmem>>, vector<48x128xf32>
    tpu.vector_store %arg7[%c0_34, %c0_35], %62 {strides = array<i32>} : memref<48x128xf32, #tpu.memory_space<vmem>>, vector<48x128xf32>,
    return
  }
  func.func @transform_0(%arg0: i32) -> (i32, i32) {
    %c0_i32 = arith.constant 0 : i32
    %c0_i32_0 = arith.constant 0 : i32
    %c0_i32_1 = arith.constant 0 : i32
    return %c0_i32, %c0_i32_0 : i32, i32
  }
  func.func @transform_1(%arg0: i32) -> (i32, i32) {
    %c0_i32 = arith.constant 0 : i32
    %c0_i32_0 = arith.constant 0 : i32
    %c0_i32_1 = arith.constant 0 : i32
    return %c0_i32, %c0_i32_0 : i32, i32
  }
  func.func @transform_2(%arg0: i32) -> (i32, i32) {
    %c0_i32 = arith.constant 0 : i32
    %c0_i32_0 = arith.constant 0 : i32
    %c0_i32_1 = arith.constant 0 : i32
    return %c0_i32, %c0_i32_0 : i32, i32
  }
  func.func @transform_3(%arg0: i32) -> (i32, i32) {
    %c0_i32 = arith.constant 0 : i32
    %c0_i32_0 = arith.constant 0 : i32
    %c0_i32_1 = arith.constant 0 : i32
    return %c0_i32, %c0_i32_0 : i32, i32
  }
  func.func @transform_4(%arg0: i32) -> (i32, i32) {
    %c0_i32 = arith.constant 0 : i32
    %c0_i32_0 = arith.constant 0 : i32
    %c0_i32_1 = arith.constant 0 : i32
    return %c0_i32, %c0_i32_0 : i32, i32
  }
  func.func @transform_5(%arg0: i32) -> (i32, i32) {
    %c0_i32 = arith.constant 0 : i32
    %c0_i32_0 = arith.constant 0 : i32
    %c0_i32_1 = arith.constant 0 : i32
    return %c0_i32, %c0_i32_0 : i32, i32
  }
  func.func @transform_6(%arg0: i32) -> (i32, i32) {
    %c0_i32 = arith.constant 0 : i32
    %c0_i32_0 = arith.constant 0 : i32
    %c0_i32_1 = arith.constant 0 : i32
    return %c0_i32, %c0_i32_0 : i32, i32
  }
}

</mosaic_0001>

<bundles_post_ra>
// kernel: forward.1
= control target key start
LH: loop header
LB: loop body
LE: loop exit
PB: predicated region body
PF: predicated region fallthrough
CT: control target
= control target key end

     0   :  { %v1990_v0 = vmov 0.0   ;;  %vm1991_vm0 = vmmov 0   ;;  %vm182_vm1 = vcmask 261120   ;;  %vm360_vm2 = vcmask 130048   ;;  %s2364_s4 = inlined_call_operand.vmem [shape: bf16[752,128], index: 4, kind: input, shape index: {}]   ;;  %s2365_s0 = inlined_call_operand.vmem [shape: bf16[48,32], index: 0, kind: input, shape index: {}]   ;;  %s2366_s1 = inlined_call_operand.vmem [shape: bf16[96,16], index: 1, kind: input, shape index: {}]   ;;  %s2367_s2 = inlined_call_operand.vmem [shape: bf16[96,96], index: 2, kind: input, shape index: {}]   ;;  %s2368_s5 = inlined_call_operand.vmem [shape: f32[8,128], index: 5, kind: input, shape index: {}]   ;;  %s2369_s3 = inlined_call_operand.vmem [shape: bf16[48,96], index: 3, kind: input, shape index: {}]   ;;  %s2370_s6 = inlined_call_operand.vmem [shape: f32[48,128], index: 6, kind: output, shape index: {}]  }
   0x1   :  { %1919 = vmatprep.subr.bf16.mxu1 %v1990_v0  ;;  %v1925_v1 = vld [vmem:[%s2364_s4 + $0x8] sm:$0xff]   ;;  %1677 = vmatprep.mubr.msk.bf16.mxu1 %vm1991_vm0, %v1990_v0  ;;  %v1926_v2 = vld [vmem:[%s2364_s4] sm:$0xff]   ;;  %v1928_v4 = vld [vmem:[%s2364_s4 + $0x18] sm:$0xff]   ;;  %vm490_vm3 = vcmask 785408  }
   0x2   :  { %1669 = vmatprep.subr.bf16.mxu0 %v1990_v0  ;;  %1673 = vmatprep.mubr.msk.bf16.mxu0 %vm1991_vm0, %v1990_v0  ;;  %v2044_v3 = vld [vmem:[%s2365_s0 + $0x8] sm:$0xff]   ;;  %v2052_v5 = vld [vmem:[%s2365_s0] sm:$0xff]   ;;  %v1930_v6 = vld [vmem:[%s2364_s4 + $0x10] sm:$0xff]  }
   0x3   :  { %1921 = vmatpush3.bf16.msra.mxu1 %v1925_v1  ;;  %1670 = vmatpush3.bf16.msra.mxu0 %v1925_v1  ;;  %v2067_v7 = vld [vmem:[%s2365_s0 + $0x10] sm:$0xff]   ;;  %v1933_v9 = vld [vmem:[%s2366_s1] sm:$0xff]   ;;  %v1934_v10 = vld [vmem:[%s2366_s1 + $0x8] sm:$0xff]  }
   0x4   :  { %1920 = vmatprep.subr.bf16.mxu1 %v1990_v0  ;;  %1671 = vmatprep.subr.bf16.mxu0 %v1990_v0  ;;  %v1932_v8 = vld [vmem:[%s2364_s4 + $0x30] sm:$0xff]   ;;  %v1935_v11 = vld [vmem:[%s2367_s2] sm:$0xff]   ;;  %v1938_v13 = vld [vmem:[%s2366_s1 + $0x18] sm:$0xff]  }
   0x5   :  { %v1937_v12 = vld [vmem:[%s2366_s1 + $0x10] sm:$0xff]   ;;  %v1941_v14 = vld [vmem:[%s2366_s1 + $0x20] sm:$0xff]   ;;  %v1942_v15 = vld [vmem:[%s2366_s1 + $0x28] sm:$0xff]  }
   0x6   :  { %v1945_v16 = vld [vmem:[%s2364_s4 + $0x70] sm:$0xff]   ;;  %v1946_v17 = vld [vmem:[%s2364_s4 + $0x68] sm:$0xff]   ;;  %v1947_v18 = vld [vmem:[%s2364_s4 + $0x60] sm:$0xff]  }
   0x7   :  { %1922 = vmatpush3.bf16.msra.mxu1 %v1926_v2  ;;  %1672 = vmatpush3.bf16.msra.mxu0 %v1926_v2  ;;  %v1948_v19 = vld [vmem:[%s2364_s4 + $0x58] sm:$0xff]   ;;  %v1936_v50 = vld [vmem:[%s2367_s2 + $0x8] sm:$0xff]   ;;  %v1939_v51 = vld [vmem:[%s2367_s2 + $0x10] sm:$0xff]  }
   0x8   :  { %1685 = vmatprep.subr.bf16.mxu1 %v1990_v0  ;;  %1701 = vmatprep.subr.bf16.mxu0 %v1932_v8  ;;  %v1940_v52 = vld [vmem:[%s2367_s2 + $0x18] sm:$0xff]   ;;  %v1943_v53 = vld [vmem:[%s2367_s2 + $0x20] sm:$0xff]   ;;  %v1944_v54 = vld [vmem:[%s2367_s2 + $0x28] sm:$0xff]  }
   0x9   :  { %v1949_v55 = vld [vmem:[%s2364_s4 + $0x50] sm:$0xff]   ;;  %v1950_v56 = vld [vmem:[%s2364_s4 + $0x48] sm:$0xff]   ;;  %v1951_v57 = vld [vmem:[%s2364_s4 + $0x40] sm:$0xff]  }
   0xa   :  { %1678 = vmatmul.mubr.msk.bf16.vlgmr.msra.gmra.mxu1 %vm182_vm1, %v2044_v3  ;;  %1674 = vmatmul.mubr.msk.bf16.vlgmr.msra.gmra.mxu0 %vm182_vm1, %v2052_v5  ;;  %v1952_v58 = vld [vmem:[%s2364_s4 + $0x38] sm:$0xff]   ;;  %v1953_v59 = vld [vmem:[%s2364_s4 + $0xb0] sm:$0xff]   ;;  %v1954_v60 = vld [vmem:[%s2364_s4 + $0xa8] sm:$0xff]  }
   0xb   :  { %1686 = vmatpush3.bf16.msra.mxu1 %v1928_v4  ;;  %1681 = vmatprep.mubr.msk.bf16.mxu1 %vm1991_vm0, %v1990_v0  ;;  %v1955_v61 = vld [vmem:[%s2364_s4 + $0xa0] sm:$0xff]   ;;  %v1956_v62 = vld [vmem:[%s2364_s4 + $0x98] sm:$0xff]   ;;  %v1957_v63 = vld [vmem:[%s2364_s4 + $0x90] sm:$0xff]  }
   0xc   :  { %1687 = vmatprep.subr.bf16.mxu1 %v1990_v0  ;;  %1702 = vmatpush3.bf16.msra.mxu0 %v1932_v8  ;;  %v590_v8 = vlaneseq }
   0xd   :  { %1703 = vmatprep.mubr.msk.bf16.mxu0 %vm360_vm2, %v1933_v9  ;;  %1739 = vmatprep.subr.bf16.mxu0 %v1945_v16 }
   0xf   :  { %1688 = vmatpush3.bf16.msra.mxu1 %v1930_v6 }
  0x12   :  { %1682 = vmatmul.mubr.msk.bf16.gmra.mxu1 %vm182_vm1, %v2067_v7  ;;  %1704 = vmatmul.mubr.msk.bf16.vlgmr.msra.gmra.mxu0 %vm360_vm2, %v1934_v10  ;;  %v2174_v10 = vshrl.u32 %v590_v8, 7 }
  0x13   :  { %1689 = vmatprep.mubr.msk.bf16.mxu1 %vm1991_vm0, %v1990_v0  ;;  %1707 = vmatprep.mubr.msk.bf16.mxu0 %vm360_vm2, %v1937_v12 }
  0x14   :  { %1740 = vmatpush3.bf16.msra.mxu0 %v1945_v16 }
  0x15   :  { %1741 = vmatprep.subr.bf16.mxu0 %v1946_v17 }
  0x18   :  { %1742 = vmatpush3.bf16.msra.mxu0 %v1946_v17 }
  0x19   :  { %1743 = vmatprep.subr.bf16.mxu0 %v1947_v18 }
  0x1a   :  { %1690 = vmatmul.mubr.msk.bf16.vlgmr.msra.gmra.mxu1 %vm182_vm1, %v2052_v5  ;;  %1708 = vmatmul.mubr.msk.bf16.gmra.mxu0 %vm360_vm2, %v1938_v13  ;;  %v592_v13 = vsub.s32 0, %v2174_v10 }
  0x1b   :  { %1693 = vmatprep.mubr.msk.bf16.mxu1 %vm1991_vm0, %v1990_v0  ;;  %1711 = vmatprep.mubr.msk.bf16.mxu0 %vm360_vm2, %v1941_v14  ;;  %v2180_v14 = vld [vmem:[%s2368_s5] sm:$0xff] }
  0x1c   :  { %1744 = vmatpush3.bf16.msra.mxu0 %v1947_v18 }
  0x1d   :  { %1745 = vmatprep.subr.bf16.mxu0 %v1948_v19 }
  0x20   :  { %1746 = vmatpush3.bf16.msra.mxu0 %v1948_v19  ;;  %v593_v19 = vrot.slane %v2180_v14, %v592_v13 }
  0x21   :  { %1747 = vmatprep.subr.bf16.mxu0 %v1949_v55 }
  0x22   :  { %1694 = vmatmul.mubr.msk.bf16.gmra.mxu1 %vm182_vm1, %v2044_v3  ;;  %1712 = vmatmul.mubr.msk.bf16.gmra.mxu0 %vm360_vm2, %v1942_v15 }
  0x23   :  { %1697 = vmatprep.mubr.msk.bf16.mxu1 %vm1991_vm0, %v1990_v0 }
  0x24   :  { %1748 = vmatpush3.bf16.msra.mxu0 %v1949_v55 }
  0x25   :  { %1749 = vmatprep.subr.bf16.mxu0 %v1950_v56 }
  0x28   :  { %1750 = vmatpush3.bf16.msra.mxu0 %v1950_v56 }
  0x29   :  { %1751 = vmatprep.subr.bf16.mxu0 %v1951_v57 }
  0x2a   :  { %1698 = vmatmul.mubr.msk.bf16.gmra.mxu1 %vm182_vm1, %v2067_v7 }
  0x2b   :  { %1727 = vmatprep.mubr.msk.bf16.mxu1 %vm490_vm3, %v1935_v11 }
  0x2c   :  { %1752 = vmatpush3.bf16.msra.mxu0 %v1951_v57 }
  0x2d   :  { %1753 = vmatprep.subr.bf16.mxu0 %v1952_v58 }
  0x30   :  { %1754 = vmatpush3.bf16.msra.mxu0 %v1952_v58 }
  0xca   :  { %v234_v20 = vpop.f32.mrf.mxu1  ;;  %v226_v21 = vpop.f32.mrf.mxu0 }
  0xcc   :  { %v1679_v22 = vpop.f32.mrf.mxu1  ;;  %v1675_v23 = vpop.f32.mrf.mxu0 }
  0xce   :  { %v237_v24 = vpop.f32.mrf.mxu1  ;;  %v229_v25 = vpop.f32.mrf.mxu0 }
  0xcf   :  { %v319_v48 = vpack.c.bf16 %v237_v24, %v234_v20  ;;  %v318_v49 = vpack.c.bf16 %v229_v25, %v226_v21 }
  0xd0   :  { %v1680_v26 = vpop.f32.mrf.mxu1  ;;  %v1676_v27 = vpop.f32.mrf.mxu0 }
  0xd2   :  { %v242_v28 = vpop.f32.mrf.mxu1  ;;  %v1705_v1 = vpop.f32.mrf.mxu0 }
  0xd4   :  { %v1683_v29 = vpop.f32.mrf.mxu1  ;;  %v413_v2 = vpop.f32.mrf.mxu0 }
  0xd6   :  { %v245_v30 = vpop.f32.mrf.mxu1  ;;  %v1706_v4 = vpop.f32.mrf.mxu0 }
  0xd7   :  { %v320_v47 = vpack.c.bf16 %v245_v30, %v242_v28 }
  0xd8   :  { %v1684_v31 = vpop.f32.mrf.mxu1  ;;  %v416_v6 = vpop.f32.mrf.mxu0 }
  0xda   :  { %v295_v32 = vpop.f32.mrf.mxu1  ;;  %v1709_v9 = vpop.f32.mrf.mxu0 }
  0xdc   :  { %v1691_v33 = vpop.f32.mrf.mxu1  ;;  %v429_v11 = vpop.f32.mrf.mxu0 }
  0xde   :  { %v298_v34 = vpop.f32.mrf.mxu1  ;;  %v1710_v16 = vpop.f32.mrf.mxu0 }
  0xdf   :  { %v321_v46 = vpack.c.bf16 %v298_v34, %v295_v32 }
  0xe0   :  { %v1692_v35 = vpop.f32.mrf.mxu1  ;;  %v432_v23 = vpop.f32.mrf.mxu0 }
  0xe2   :  { %v303_v36 = vpop.f32.mrf.mxu1  ;;  %v1713_v31 = vpop.f32.mrf.mxu0 }
  0xe4   :  { %v1695_v37 = vpop.f32.mrf.mxu1 }
  0xe6   :  { %v306_v38 = vpop.f32.mrf.mxu1 }
  0xe7   :  { %v322_v45 = vpack.c.bf16 %v306_v38, %v303_v36 }
  0xe8   :  { %v1696_v39 = vpop.f32.mrf.mxu1 }
  0xea   :  { %v311_v40 = vpop.f32.mrf.mxu1 }
  0xec   :  { %v1699_v41 = vpop.f32.mrf.mxu1 }
  0xee   :  { %v314_v42 = vpop.f32.mrf.mxu1 }
  0xef   :  { %v323_v43 = vpack.c.bf16 %v314_v42, %v311_v40  ;;  %v445_v42 = vpop.f32.mrf.mxu0 }
  0xf0   :  { %v1700_v44 = vpop.f32.mrf.mxu1 }
  0xf1   :  { %1715 = vmatprep.subr.bf16.mxu1 %v323_v43 }
  0xf2   :  { %1716 = vmatpush3.bf16.msra.mxu1 %v323_v43 }
  0xf3   :  { %1717 = vmatprep.subr.bf16.mxu1 %v322_v45 }
  0xf6   :  { %1718 = vmatpush3.bf16.msra.mxu1 %v322_v45 }
  0xf7   :  { %1719 = vmatprep.subr.bf16.mxu1 %v321_v46 }
  0xfa   :  { %1720 = vmatpush3.bf16.msra.mxu1 %v321_v46 }
  0xfb   :  { %1721 = vmatprep.subr.bf16.mxu1 %v320_v47 }
  0xfe   :  { %1722 = vmatpush3.bf16.msra.mxu1 %v320_v47 }
  0xff   :  { %1723 = vmatprep.subr.bf16.mxu1 %v319_v48 }
 0x102   :  { %1724 = vmatpush3.bf16.msra.mxu1 %v319_v48 }
 0x103   :  { %1725 = vmatprep.subr.bf16.mxu1 %v318_v49 }
 0x106   :  { %1726 = vmatpush3.bf16.msra.mxu1 %v318_v49 }
 0x107   :  { %1767 = vmatprep.subr.bf16.mxu1 %v1953_v59 }
 0x109   :  { %1728 = vmatmul.mubr.msk.bf16.vlgmr.msra.gmra.mxu1 %vm490_vm3, %v1936_v50 }
 0x10a   :  { %1731 = vmatprep.mubr.msk.bf16.mxu1 %vm490_vm3, %v1939_v51  ;;  %1768 = vmatpush3.bf16.msra.mxu1 %v1953_v59  ;;  %v1714_v51 = vpop.f32.mrf.mxu0 }
 0x10b   :  { %1769 = vmatprep.subr.bf16.mxu1 %v1954_v60 }
 0x10e   :  { %1770 = vmatpush3.bf16.msra.mxu1 %v1954_v60 }
 0x10f   :  { %1771 = vmatprep.subr.bf16.mxu1 %v1955_v61 }
 0x111   :  { %1732 = vmatmul.mubr.msk.bf16.gmra.mxu1 %vm490_vm3, %v1940_v52 }
 0x112   :  { %1735 = vmatprep.mubr.msk.bf16.mxu1 %vm490_vm3, %v1943_v53  ;;  %1772 = vmatpush3.bf16.msra.mxu1 %v1955_v61  ;;  %v448_v61 = vpop.f32.mrf.mxu0 }
 0x113   :  { %1773 = vmatprep.subr.bf16.mxu1 %v1956_v62 }
 0x116   :  { %1774 = vmatpush3.bf16.msra.mxu1 %v1956_v62 }
 0x117   :  { %1775 = vmatprep.subr.bf16.mxu1 %v1957_v63 }
 0x119   :  { %1736 = vmatmul.mubr.msk.bf16.gmra.mxu1 %vm490_vm3, %v1944_v54 }
 0x11a   :  { %1776 = vmatpush3.bf16.msra.mxu1 %v1957_v63 }
 0x1c9   :  { %v1729_v12 = vpop.f32.mrf.mxu1 }
 0x1ca   :  { %v552_v18 = vadd.f32 %v1729_v12, %v1705_v1 }
 0x1cb   :  { %v543_v15 = vpop.f32.mrf.mxu1 }
 0x1cc   :  { %v544_v17 = vadd.f32 %v543_v15, %v413_v2  ;;  %v596_v27 = vadd.f32 %v593_v19, %v552_v18  ;;  %v1959_v18 = vld [vmem:[%s2364_s4 + $0x80] sm:$0xff]  }
 0x1cd   :  { %v1730_v20 = vpop.f32.mrf.mxu1 }
 0x1ce   :  { %v555_v21 = vadd.f32 %v1730_v20, %v1706_v4  ;;  %v594_v24 = vadd.f32 %v593_v19, %v544_v17  ;;  %v608_v36 = vmax.f32 %v596_v27, 0.0  ;;  %v1958_v17 = vld [vmem:[%s2364_s4 + $0x88] sm:$0xff]   ;;  %v1961_v20 = vld [vmem:[%s2364_s4 + $0xf0] sm:$0xff]  }
 0x1cf   :  { %v546_v22 = vpop.f32.mrf.mxu1  ;;  %1777 = vmatprep.subr.bf16.mxu1 %v1958_v17  ;;  %1795 = vmatprep.subr.bf16.mxu0 %v1961_v20 }
 0x1d0   :  { %v597_v25 = vadd.f32 %v593_v19, %v555_v21  ;;  %v547_v26 = vadd.f32 %v546_v22, %v416_v6  ;;  %v606_v33 = vmax.f32 %v594_v24, 0.0  ;;  %1778 = vmatpush3.bf16.msra.mxu1 %v1958_v17  ;;  %v1962_v21 = vld [vmem:[%s2364_s4 + $0xe8] sm:$0xff]   ;;  %v1963_v22 = vld [vmem:[%s2364_s4 + $0xe0] sm:$0xff]   ;;  %v1965_v24 = vld [vmem:[%s2364_s4 + $0xd0] sm:$0xff]  }
 0x1d1   :  { %v1733_v28 = vpop.f32.mrf.mxu1  ;;  %1779 = vmatprep.subr.bf16.mxu1 %v1959_v18 }
 0x1d2   :  { %v595_v29 = vadd.f32 %v593_v19, %v547_v26  ;;  %v609_v30 = vmax.f32 %v597_v25, 0.0  ;;  %v568_v37 = vadd.f32 %v1733_v28, %v1709_v9  ;;  %v626_v25 = vsub.s32 1, %v2174_v10 }
 0x1d3   :  { %v559_v32 = vpop.f32.mrf.mxu1 }
 0x1d4   :  { %v607_v34 = vmax.f32 %v595_v29, 0.0  ;;  %v560_v35 = vadd.f32 %v559_v32, %v429_v11  ;;  %v619_v41 = vpack.c.bf16 %v609_v30, %v608_v36  ;;  %v600_v47 = vadd.f32 %v593_v19, %v568_v37  ;;  %1780 = vmatpush3.bf16.msra.mxu1 %v1959_v18 }
 0x1d5   :  { %v1734_v38 = vpop.f32.mrf.mxu1  ;;  %v627_v27 = vrot.slane %v2180_v14, %v626_v25 }
 0x1d6   :  { %v571_v39 = vadd.f32 %v1734_v38, %v1710_v16  ;;  %v618_v40 = vpack.c.bf16 %v607_v34, %v606_v33  ;;  %v598_v44 = vadd.f32 %v593_v19, %v560_v35  ;;  %v612_v56 = vmax.f32 %v600_v47, 0.0 }
 0x1d7   :  { %v562_v43 = vpop.f32.mrf.mxu1 }
 0x1d8   :  { %v601_v45 = vadd.f32 %v593_v19, %v571_v39  ;;  %v563_v46 = vadd.f32 %v562_v43, %v432_v23  ;;  %1755 = vmatprep.mubr.bf16.mxu0 %v618_v40  ;;  %v610_v53 = vmax.f32 %v598_v44, 0.0  ;;  %v1964_v23 = vld [vmem:[%s2364_s4 + $0xd8] sm:$0xff]  }
 0x1d9   :  { %v1737_v48 = vpop.f32.mrf.mxu1  ;;  %1756 = vmatmul.mubr.bf16.vlgmr.msra.gmra.mxu0 %v619_v41 }
 0x1da   :  { %v599_v49 = vadd.f32 %v593_v19, %v563_v46  ;;  %v613_v50 = vmax.f32 %v601_v45, 0.0  ;;  %v584_v57 = vadd.f32 %v1737_v48, %v1713_v31  ;;  %1796 = vmatpush3.bf16.msra.mxu0 %v1961_v20 }
 0x1db   :  { %v575_v52 = vpop.f32.mrf.mxu1  ;;  %1797 = vmatprep.subr.bf16.mxu0 %v1962_v21 }
 0x1dc   :  { %v611_v54 = vmax.f32 %v599_v49, 0.0  ;;  %v576_v55 = vadd.f32 %v575_v52, %v445_v42  ;;  %v621_v63 = vpack.c.bf16 %v613_v50, %v612_v56  ;;  %v604_v6 = vadd.f32 %v593_v19, %v584_v57 }
 0x1dd   :  { %v1738_v58 = vpop.f32.mrf.mxu1 }
 0x1de   :  { %v587_v59 = vadd.f32 %v1738_v58, %v1714_v51  ;;  %v620_v60 = vpack.c.bf16 %v611_v54, %v610_v53  ;;  %v602_v1 = vadd.f32 %v593_v19, %v576_v55  ;;  %v616_v13 = vmax.f32 %v604_v6, 0.0  ;;  %1798 = vmatpush3.bf16.msra.mxu0 %v1962_v21 }
 0x1df   :  { %v578_v62 = vpop.f32.mrf.mxu1  ;;  %1799 = vmatprep.subr.bf16.mxu0 %v1963_v22 }
 0x1e0   :  { %v605_v2 = vadd.f32 %v593_v19, %v587_v59  ;;  %v579_v4 = vadd.f32 %v578_v62, %v448_v61  ;;  %1759 = vmatprep.mubr.bf16.mxu0 %v620_v60  ;;  %v614_v11 = vmax.f32 %v602_v1, 0.0 }
 0x1e1   :  { %1760 = vmatmul.mubr.bf16.gmra.mxu0 %v621_v63 }
 0x1e2   :  { %v603_v8 = vadd.f32 %v593_v19, %v579_v4  ;;  %v617_v9 = vmax.f32 %v605_v2, 0.0  ;;  %v1960_v19 = vld [vmem:[%s2364_s4 + $0x78] sm:$0xff]   ;;  %1800 = vmatpush3.bf16.msra.mxu0 %v1963_v22 }
 0x1e3   :  { %1781 = vmatprep.subr.bf16.mxu1 %v1960_v19  ;;  %1801 = vmatprep.subr.bf16.mxu0 %v1964_v23 }
 0x1e4   :  { %v615_v12 = vmax.f32 %v603_v8, 0.0  ;;  %v623_v16 = vpack.c.bf16 %v617_v9, %v616_v13  ;;  %1782 = vmatpush3.bf16.msra.mxu1 %v1960_v19  ;;  %v1966_v9 = vld [vmem:[%s2364_s4 + $0xc8] sm:$0xff]   ;;  %v777_v13 = vsub.s32 2, %v2174_v10 }
 0x1e5   :  { %1823 = vmatprep.subr.bf16.mxu1 %v1990_v0 }
 0x1e6   :  { %v622_v15 = vpack.c.bf16 %v615_v12, %v614_v11  ;;  %1802 = vmatpush3.bf16.msra.mxu0 %v1964_v23  ;;  %v1967_v11 = vld [vmem:[%s2364_s4 + $0xc0] sm:$0xff]   ;;  %v1968_v12 = vld [vmem:[%s2364_s4 + $0xb8] sm:$0xff]  }
 0x1e7   :  { %1803 = vmatprep.subr.bf16.mxu0 %v1965_v24 }
 0x1e8   :  { %1763 = vmatprep.mubr.bf16.mxu0 %v622_v15 }
 0x1e9   :  { %1764 = vmatmul.mubr.bf16.gmra.mxu0 %v623_v16  ;;  %v778_v16 = vrot.slane %v2180_v14, %v777_v13 }
 0x1ea   :  { %1804 = vmatpush3.bf16.msra.mxu0 %v1965_v24 }
 0x1eb   :  { %1805 = vmatprep.subr.bf16.mxu0 %v1966_v9 }
 0x1ee   :  { %1806 = vmatpush3.bf16.msra.mxu0 %v1966_v9 }
 0x1ef   :  { %1807 = vmatprep.subr.bf16.mxu0 %v1967_v11 }
 0x1f2   :  { %1808 = vmatpush3.bf16.msra.mxu0 %v1967_v11 }
 0x1f3   :  { %1809 = vmatprep.subr.bf16.mxu0 %v1968_v12 }
 0x1f6   :  { %1810 = vmatpush3.bf16.msra.mxu0 %v1968_v12 }
 0x1f7   :  { %1875 = vmatprep.subr.bf16.mxu0 %v1990_v0 }
 0x299   :  { %v1757_v26 = vpop.f32.mrf.mxu0 }
 0x29a   :  { %v719_v32 = vadd.f32 %v1757_v26, %v627_v27 }
 0x29b   :  { %v710_v28 = vpop.f32.mrf.mxu0 }
 0x29c   :  { %v711_v30 = vadd.f32 %v710_v28, %v627_v27  ;;  %v759_v39 = vmax.f32 %v719_v32, 0.0 }
 0x29d   :  { %v1758_v29 = vpop.f32.mrf.mxu0 }
 0x29e   :  { %v722_v31 = vadd.f32 %v1758_v29, %v627_v27  ;;  %v757_v37 = vmax.f32 %v711_v30, 0.0 }
 0x29f   :  { %v713_v33 = vpop.f32.mrf.mxu0 }
 0x2a0   :  { %v714_v34 = vadd.f32 %v713_v33, %v627_v27  ;;  %v760_v35 = vmax.f32 %v722_v31, 0.0 }
 0x2a1   :  { %v1761_v36 = vpop.f32.mrf.mxu0 }
 0x2a2   :  { %v758_v38 = vmax.f32 %v714_v34, 0.0  ;;  %v770_v42 = vpack.c.bf16 %v760_v35, %v759_v39  ;;  %v735_v46 = vadd.f32 %v1761_v36, %v627_v27 }
 0x2a3   :  { %v726_v40 = vpop.f32.mrf.mxu0 }
 0x2a4   :  { %v769_v41 = vpack.c.bf16 %v758_v38, %v757_v37  ;;  %v727_v44 = vadd.f32 %v726_v40, %v627_v27  ;;  %v763_v53 = vmax.f32 %v735_v46, 0.0 }
 0x2a5   :  { %v1762_v43 = vpop.f32.mrf.mxu0 }
 0x2a6   :  { %v738_v45 = vadd.f32 %v1762_v43, %v627_v27  ;;  %1783 = vmatprep.mubr.bf16.mxu1 %v769_v41  ;;  %v761_v51 = vmax.f32 %v727_v44, 0.0 }
 0x2a7   :  { %v729_v47 = vpop.f32.mrf.mxu0  ;;  %1784 = vmatmul.mubr.bf16.vlgmr.msra.gmra.mxu1 %v770_v42 }
 0x2a8   :  { %v730_v48 = vadd.f32 %v729_v47, %v627_v27  ;;  %v764_v49 = vmax.f32 %v738_v45, 0.0 }
 0x2a9   :  { %v1765_v50 = vpop.f32.mrf.mxu0 }
 0x2aa   :  { %v762_v52 = vmax.f32 %v730_v48, 0.0  ;;  %v772_v56 = vpack.c.bf16 %v764_v49, %v763_v53  ;;  %v751_v60 = vadd.f32 %v1765_v50, %v627_v27 }
 0x2ab   :  { %v742_v54 = vpop.f32.mrf.mxu0 }
 0x2ac   :  { %v771_v55 = vpack.c.bf16 %v762_v52, %v761_v51  ;;  %v743_v58 = vadd.f32 %v742_v54, %v627_v27  ;;  %v767_v4 = vmax.f32 %v751_v60, 0.0 }
 0x2ad   :  { %v1766_v57 = vpop.f32.mrf.mxu0 }
 0x2ae   :  { %v754_v59 = vadd.f32 %v1766_v57, %v627_v27  ;;  %1787 = vmatprep.mubr.bf16.mxu1 %v771_v55  ;;  %v765_v1 = vmax.f32 %v743_v58, 0.0  ;;  %v1975_v58 = vld [vmem:[%s2364_s4 + $0x28] sm:$0xff]  }
 0x2af   :  { %v745_v61 = vpop.f32.mrf.mxu0  ;;  %1788 = vmatmul.mubr.bf16.gmra.mxu1 %v772_v56 }
 0x2b0   :  { %v746_v62 = vadd.f32 %v745_v61, %v627_v27  ;;  %v768_v63 = vmax.f32 %v754_v59, 0.0  ;;  %v1979_v59 = vld [vmem:[%s2364_s4 + $0x20] sm:$0xff]  }
 0x2b2   :  { %v766_v2 = vmax.f32 %v746_v62, 0.0  ;;  %v774_v8 = vpack.c.bf16 %v768_v63, %v767_v4  ;;  %v928_v4 = vsub.s32 3, %v2174_v10 }
 0x2b4   :  { %v773_v6 = vpack.c.bf16 %v766_v2, %v765_v1 }
 0x2b6   :  { %1791 = vmatprep.mubr.bf16.mxu1 %v773_v6 }
 0x2b7   :  { %1792 = vmatmul.mubr.bf16.gmra.mxu1 %v774_v8  ;;  %v929_v8 = vrot.slane %v2180_v14, %v928_v4 }
 0x2b8   :  { %1835 = vmatprep.mubr.msk.bf16.mxu1 %vm1991_vm0, %v1990_v0 }
 0x367   :  { %v1785_v15 = vpop.f32.mrf.mxu1 }
 0x368   :  { %v870_v21 = vadd.f32 %v1785_v15, %v778_v16 }
 0x369   :  { %v861_v17 = vpop.f32.mrf.mxu1 }
 0x36a   :  { %v862_v19 = vadd.f32 %v861_v17, %v778_v16  ;;  %v910_v28 = vmax.f32 %v870_v21, 0.0 }
 0x36b   :  { %v1786_v18 = vpop.f32.mrf.mxu1 }
 0x36c   :  { %v873_v20 = vadd.f32 %v1786_v18, %v778_v16  ;;  %v908_v26 = vmax.f32 %v862_v19, 0.0 }
 0x36d   :  { %v864_v22 = vpop.f32.mrf.mxu1 }
 0x36e   :  { %v865_v23 = vadd.f32 %v864_v22, %v778_v16  ;;  %v911_v24 = vmax.f32 %v873_v20, 0.0 }
 0x36f   :  { %v1789_v25 = vpop.f32.mrf.mxu1 }
 0x370   :  { %v909_v27 = vmax.f32 %v865_v23, 0.0  ;;  %v921_v31 = vpack.c.bf16 %v911_v24, %v910_v28  ;;  %v886_v35 = vadd.f32 %v1789_v25, %v778_v16 }
 0x371   :  { %v877_v29 = vpop.f32.mrf.mxu1 }
 0x372   :  { %v920_v30 = vpack.c.bf16 %v909_v27, %v908_v26  ;;  %v878_v33 = vadd.f32 %v877_v29, %v778_v16  ;;  %v914_v42 = vmax.f32 %v886_v35, 0.0 }
 0x373   :  { %v1790_v32 = vpop.f32.mrf.mxu1 }
 0x374   :  { %v889_v34 = vadd.f32 %v1790_v32, %v778_v16  ;;  %1811 = vmatprep.mubr.bf16.mxu0 %v920_v30  ;;  %v912_v40 = vmax.f32 %v878_v33, 0.0 }
 0x375   :  { %v880_v36 = vpop.f32.mrf.mxu1  ;;  %1812 = vmatmul.mubr.bf16.vlgmr.msra.gmra.mxu0 %v921_v31 }
 0x376   :  { %v881_v37 = vadd.f32 %v880_v36, %v778_v16  ;;  %v915_v38 = vmax.f32 %v889_v34, 0.0  ;;  %1876 = vmatpush3.bf16.msra.mxu0 %v1975_v58  ;;  %v1984_v58 = vld [vmem:[%s2364_s4 + $0x160] sm:$0xff]  }
 0x377   :  { %v1793_v39 = vpop.f32.mrf.mxu1  ;;  %1877 = vmatprep.subr.bf16.mxu0 %v1990_v0 }
 0x378   :  { %v913_v41 = vmax.f32 %v881_v37, 0.0  ;;  %v923_v45 = vpack.c.bf16 %v915_v38, %v914_v42  ;;  %v902_v49 = vadd.f32 %v1793_v39, %v778_v16 }
 0x379   :  { %v893_v43 = vpop.f32.mrf.mxu1 }
 0x37a   :  { %v922_v44 = vpack.c.bf16 %v913_v41, %v912_v40  ;;  %v894_v47 = vadd.f32 %v893_v43, %v778_v16  ;;  %v918_v55 = vmax.f32 %v902_v49, 0.0  ;;  %1878 = vmatpush3.bf16.msra.mxu0 %v1979_v59  ;;  %v1969_v43 = vld [vmem:[%s2369_s3] sm:$0xff]   ;;  %v1971_v49 = vld [vmem:[%s2369_s3 + $0x10] sm:$0xff]  }
 0x37b   :  { %v1794_v46 = vpop.f32.mrf.mxu1  ;;  %1891 = vmatprep.subr.bf16.mxu0 %v1990_v0 }
 0x37c   :  { %v905_v48 = vadd.f32 %v1794_v46, %v778_v16  ;;  %1815 = vmatprep.mubr.bf16.mxu0 %v922_v44  ;;  %v916_v53 = vmax.f32 %v894_v47, 0.0  ;;  %v1972_v44 = vld [vmem:[%s2364_s4 + $0x130] sm:$0xff]   ;;  %v1970_v46 = vld [vmem:[%s2369_s3 + $0x8] sm:$0xff]   ;;  %v1974_v47 = vld [vmem:[%s2364_s4 + $0x120] sm:$0xff]  }
 0x37d   :  { %v896_v50 = vpop.f32.mrf.mxu1  ;;  %1816 = vmatmul.mubr.bf16.gmra.mxu0 %v923_v45  ;;  %v1973_v45 = vld [vmem:[%s2364_s4 + $0x128] sm:$0xff]  }
 0x37e   :  { %v897_v51 = vadd.f32 %v896_v50, %v778_v16  ;;  %v919_v52 = vmax.f32 %v905_v48, 0.0  ;;  %v1976_v48 = vld [vmem:[%s2364_s4 + $0x118] sm:$0xff]   ;;  %v1977_v50 = vld [vmem:[%s2364_s4 + $0x110] sm:$0xff]  }
 0x380   :  { %v917_v54 = vmax.f32 %v897_v51, 0.0  ;;  %v925_v57 = vpack.c.bf16 %v919_v52, %v918_v55  ;;  %v1978_v51 = vld [vmem:[%s2364_s4 + $0x108] sm:$0xff]   ;;  %v1980_v52 = vld [vmem:[%s2364_s4 + $0x100] sm:$0xff]  }
 0x381   :  { %v1983_v55 = vld [vmem:[%s2364_s4 + $0x168] sm:$0xff]  }
 0x382   :  { %v924_v56 = vpack.c.bf16 %v917_v54, %v916_v53  ;;  %v1981_v53 = vld [vmem:[%s2364_s4 + $0xf8] sm:$0xff]   ;;  %v1982_v54 = vld [vmem:[%s2364_s4 + $0x170] sm:$0xff]  }
 0x384   :  { %1819 = vmatprep.mubr.bf16.mxu0 %v924_v56 }
 0x385   :  { %1820 = vmatmul.mubr.bf16.gmra.mxu0 %v925_v57 }
 0x386   :  { %1879 = vmatprep.mubr.msk.bf16.mxu0 %vm1991_vm0, %v1990_v0 }
 0x38d   :  { %1880 = vmatmul.mubr.msk.bf16.vlgmr.msra.gmra.mxu0 %vm182_vm1, %v2052_v5 }
 0x38e   :  { %1883 = vmatprep.mubr.msk.bf16.mxu0 %vm1991_vm0, %v1990_v0  ;;  %1892 = vmatpush3.bf16.msra.mxu0 %v1982_v54 }
 0x38f   :  { %1893 = vmatprep.subr.bf16.mxu0 %v1990_v0 }
 0x392   :  { %1894 = vmatpush3.bf16.msra.mxu0 %v1983_v55 }
 0x393   :  { %1895 = vmatprep.subr.bf16.mxu0 %v1990_v0 }
 0x395   :  { %1884 = vmatmul.mubr.msk.bf16.gmra.mxu0 %vm182_vm1, %v2044_v3 }
 0x396   :  { %1887 = vmatprep.mubr.msk.bf16.mxu0 %vm1991_vm0, %v1990_v0  ;;  %1896 = vmatpush3.bf16.msra.mxu0 %v1984_v58 }
 0x397   :  { %1897 = vmatprep.subr.bf16.mxu0 %v1990_v0 }
 0x39d   :  { %1888 = vmatmul.mubr.msk.bf16.gmra.mxu0 %vm182_vm1, %v2067_v7 }
 0x39e   :  { %1907 = vmatprep.mubr.msk.bf16.mxu0 %vm1991_vm0, %v1990_v0 }
 0x435   :  { %v1813_v60 = vpop.f32.mrf.mxu0 }
 0x436   :  { %v1021_v32 = vadd.f32 %v1813_v60, %v929_v8 }
 0x437   :  { %v1012_v61 = vpop.f32.mrf.mxu0 }
 0x438   :  { %v1061_v37 = vmax.f32 %v1021_v32, 0.0  ;;  %v1013_v38 = vadd.f32 %v1012_v61, %v929_v8  ;;  %v1985_v61 = vld [vmem:[%s2364_s4 + $0x158] sm:$0xff]  }
 0x439   :  { %v1814_v62 = vpop.f32.mrf.mxu0  ;;  %1898 = vmatpush3.bf16.msra.mxu0 %v1985_v61 }
 0x43a   :  { %v1024_v29 = vadd.f32 %v1814_v62, %v929_v8  ;;  %v1059_v41 = vmax.f32 %v1013_v38, 0.0  ;;  %v1986_v62 = vld [vmem:[%s2364_s4 + $0x150] sm:$0xff]   ;;  %1899 = vmatprep.subr.bf16.mxu0 %v1990_v0 }
 0x43b   :  { %v1015_v63 = vpop.f32.mrf.mxu0 }
 0x43c   :  { %v1062_v34 = vmax.f32 %v1024_v29, 0.0  ;;  %v1016_v35 = vadd.f32 %v1015_v63, %v929_v8 }
 0x43d   :  { %v1817_v5 = vpop.f32.mrf.mxu0  ;;  %1900 = vmatpush3.bf16.msra.mxu0 %v1986_v62 }
 0x43e   :  { %v1037_v22 = vadd.f32 %v1817_v5, %v929_v8  ;;  %v1072_v39 = vpack.c.bf16 %v1062_v34, %v1061_v37  ;;  %v1060_v40 = vmax.f32 %v1016_v35, 0.0  ;;  %1901 = vmatprep.subr.bf16.mxu0 %v1990_v0 }
 0x43f   :  { %v1028_v1 = vpop.f32.mrf.mxu0 }
 0x440   :  { %v1065_v27 = vmax.f32 %v1037_v22, 0.0  ;;  %v1029_v28 = vadd.f32 %v1028_v1, %v929_v8  ;;  %v1071_v42 = vpack.c.bf16 %v1060_v40, %v1059_v41 }
 0x441   :  { %v1818_v2 = vpop.f32.mrf.mxu0 }
 0x442   :  { %v1040_v19 = vadd.f32 %v1818_v2, %v929_v8  ;;  %v1063_v33 = vmax.f32 %v1029_v28, 0.0  ;;  %v1337_v28 = vsub.s32 4, %v2174_v10 }
 0x443   :  { %v1031_v6 = vpop.f32.mrf.mxu0 }
 0x444   :  { %v1066_v24 = vmax.f32 %v1040_v19, 0.0  ;;  %v1032_v25 = vadd.f32 %v1031_v6, %v929_v8 }
 0x445   :  { %v1821_v3 = vpop.f32.mrf.mxu0 }
 0x446   :  { %v1053_v11 = vadd.f32 %v1821_v3, %v929_v8  ;;  %v1074_v30 = vpack.c.bf16 %v1066_v24, %v1065_v27  ;;  %v1064_v31 = vmax.f32 %v1032_v25, 0.0 }
 0x447   :  { %v1044_v9 = vpop.f32.mrf.mxu0 }
 0x448   :  { %v1069_v15 = vmax.f32 %v1053_v11, 0.0  ;;  %v1045_v16 = vadd.f32 %v1044_v9, %v929_v8  ;;  %v1073_v36 = vpack.c.bf16 %v1064_v31, %v1063_v33  ;;  %v1338_v31 = vrot.slane %v2180_v14, %v1337_v28 }
 0x449   :  { %v1822_v12 = vpop.f32.mrf.mxu0 }
 0x44a   :  { %v1056_v7 = vadd.f32 %v1822_v12, %v929_v8  ;;  %v1067_v23 = vmax.f32 %v1045_v16, 0.0 }
 0x44b   :  { %v1047_v13 = vpop.f32.mrf.mxu0 }
 0x44c   :  { %v1070_v17 = vmax.f32 %v1056_v7, 0.0  ;;  %v1048_v18 = vadd.f32 %v1047_v13, %v929_v8 }
 0x44d   :  { %v1312_v56 = vpop.f32.mrf.mxu0 }
 0x44e   :  { %v1076_v20 = vpack.c.bf16 %v1070_v17, %v1069_v15  ;;  %v1068_v21 = vmax.f32 %v1048_v18, 0.0  ;;  %v1987_v17 = vld [vmem:[%s2364_s4 + $0x148] sm:$0xff]  }
 0x44f   :  { %v1881_v57 = vpop.f32.mrf.mxu0  ;;  %1902 = vmatpush3.bf16.msra.mxu0 %v1987_v17 }
 0x450   :  { %1824 = vmatpush3.bf16.msra.mxu1 %v1076_v20  ;;  %v1075_v26 = vpack.c.bf16 %v1068_v21, %v1067_v23  ;;  %1903 = vmatprep.subr.bf16.mxu0 %v1990_v0  ;;  %v1988_v20 = vld [vmem:[%s2364_s4 + $0x140] sm:$0xff]   ;;  %v1989_v23 = vld [vmem:[%s2364_s4 + $0x138] sm:$0xff]  }
 0x451   :  { %1825 = vmatprep.subr.bf16.mxu1 %v1990_v0  ;;  %v1315_v59 = vpop.f32.mrf.mxu0 }
 0x453   :  { %v1882_v60 = vpop.f32.mrf.mxu0  ;;  %1904 = vmatpush3.bf16.msra.mxu0 %v1988_v20 }
 0x454   :  { %1826 = vmatpush3.bf16.msra.mxu1 %v1075_v26  ;;  %1905 = vmatprep.subr.bf16.mxu0 %v1990_v0 }
 0x455   :  { %1827 = vmatprep.subr.bf16.mxu1 %v1990_v0  ;;  %v1320_v18 = vpop.f32.mrf.mxu0 }
 0x457   :  { %v1885_v19 = vpop.f32.mrf.mxu0  ;;  %1906 = vmatpush3.bf16.msra.mxu0 %v1989_v23 }
 0x458   :  { %1828 = vmatpush3.bf16.msra.mxu1 %v1074_v30 }
 0x459   :  { %1829 = vmatprep.subr.bf16.mxu1 %v1990_v0  ;;  %v1323_v21 = vpop.f32.mrf.mxu0 }
 0x45b   :  { %v1886_v22 = vpop.f32.mrf.mxu0 }
 0x45c   :  { %1830 = vmatpush3.bf16.msra.mxu1 %v1073_v36 }
 0x45d   :  { %1831 = vmatprep.subr.bf16.mxu1 %v1990_v0  ;;  %v1328_v24 = vpop.f32.mrf.mxu0 }
 0x45f   :  { %v1889_v25 = vpop.f32.mrf.mxu0 }
 0x460   :  { %1832 = vmatpush3.bf16.msra.mxu1 %v1072_v39 }
 0x461   :  { %1833 = vmatprep.subr.bf16.mxu1 %v1990_v0  ;;  %v1331_v26 = vpop.f32.mrf.mxu0 }
 0x463   :  { %v1890_v27 = vpop.f32.mrf.mxu0 }
 0x464   :  { %1834 = vmatpush3.bf16.msra.mxu1 %v1071_v42 }
 0x465   :  { %1847 = vmatprep.subr.bf16.mxu1 %v1990_v0 }
 0x467   :  { %1836 = vmatmul.mubr.msk.bf16.vlgmr.msra.gmra.mxu1 %vm490_vm3, %v1969_v43 }
 0x468   :  { %1839 = vmatprep.mubr.msk.bf16.mxu1 %vm1991_vm0, %v1990_v0  ;;  %1848 = vmatpush3.bf16.msra.mxu1 %v1972_v44 }
 0x469   :  { %1849 = vmatprep.subr.bf16.mxu1 %v1990_v0 }
 0x46c   :  { %1850 = vmatpush3.bf16.msra.mxu1 %v1973_v45 }
 0x46d   :  { %1851 = vmatprep.subr.bf16.mxu1 %v1990_v0 }
 0x46f   :  { %1840 = vmatmul.mubr.msk.bf16.gmra.mxu1 %vm490_vm3, %v1970_v46 }
 0x470   :  { %1843 = vmatprep.mubr.msk.bf16.mxu1 %vm1991_vm0, %v1990_v0  ;;  %1852 = vmatpush3.bf16.msra.mxu1 %v1974_v47 }
 0x471   :  { %1853 = vmatprep.subr.bf16.mxu1 %v1990_v0 }
 0x474   :  { %1854 = vmatpush3.bf16.msra.mxu1 %v1976_v48 }
 0x475   :  { %1855 = vmatprep.subr.bf16.mxu1 %v1990_v0 }
 0x477   :  { %1844 = vmatmul.mubr.msk.bf16.gmra.mxu1 %vm490_vm3, %v1971_v49 }
 0x478   :  { %1856 = vmatpush3.bf16.msra.mxu1 %v1977_v50  ;;  %1863 = vmatprep.mubr.msk.bf16.mxu1 %vm1991_vm0, %v1990_v0 }
 0x479   :  { %1857 = vmatprep.subr.bf16.mxu1 %v1990_v0 }
 0x47c   :  { %1858 = vmatpush3.bf16.msra.mxu1 %v1978_v51 }
 0x47d   :  { %1859 = vmatprep.subr.bf16.mxu1 %v1990_v0 }
 0x480   :  { %1860 = vmatpush3.bf16.msra.mxu1 %v1980_v52 }
 0x481   :  { %1861 = vmatprep.subr.bf16.mxu1 %v1990_v0 }
 0x484   :  { %1862 = vmatpush3.bf16.msra.mxu1 %v1981_v53 }
 0x527   :  { %v1135_v63 = vpop.f32.mrf.mxu1 }
 0x529   :  { %v1837_v5 = vpop.f32.mrf.mxu1 }
 0x52b   :  { %v1138_v1 = vpop.f32.mrf.mxu1 }
 0x52c   :  { %v1158_v2 = vpack.c.bf16 %v1138_v1, %v1135_v63  ;;  %v1356_v63 = vsub.s32 5, %v2174_v10 }
 0x52d   :  { %v1838_v4 = vpop.f32.mrf.mxu1 }
 0x52e   :  { %1864 = vmatmul.mubr.bf16.vlgmr.msra.gmra.mxu1 %v1158_v2  ;;  %v1357_v5 = vrot.slane %v2180_v14, %v1356_v63 }
 0x52f   :  { %v1143_v6 = vpop.f32.mrf.mxu1  ;;  %1867 = vmatprep.mubr.msk.bf16.mxu1 %vm1991_vm0, %v1990_v0 }
 0x531   :  { %v1841_v3 = vpop.f32.mrf.mxu1 }
 0x533   :  { %v1146_v8 = vpop.f32.mrf.mxu1 }
 0x534   :  { %v1159_v9 = vpack.c.bf16 %v1146_v8, %v1143_v6 }
 0x535   :  { %v1842_v11 = vpop.f32.mrf.mxu1 }
 0x536   :  { %1868 = vmatmul.mubr.bf16.gmra.mxu1 %v1159_v9 }
 0x537   :  { %v1151_v12 = vpop.f32.mrf.mxu1  ;;  %1871 = vmatprep.mubr.msk.bf16.mxu1 %vm1991_vm0, %v1990_v0 }
 0x539   :  { %v1845_v7 = vpop.f32.mrf.mxu1 }
 0x53b   :  { %v1154_v13 = vpop.f32.mrf.mxu1 }
 0x53c   :  { %v1160_v15 = vpack.c.bf16 %v1154_v13, %v1151_v12 }
 0x53d   :  { %v1846_v16 = vpop.f32.mrf.mxu1 }
 0x53e   :  { %1872 = vmatmul.mubr.bf16.gmra.mxu1 %v1160_v15 }
 0x5ee   :  { %v1243_v29 = vpop.f32.mrf.mxu1 }
 0x5ef   :  { %v1313_v30 = vadd.f32 %v1312_v56, %v1243_v29 }
 0x5f0   :  { %v1865_v32 = vpop.f32.mrf.mxu1 }
 0x5f1   :  { %v1339_v34 = vadd.f32 %v1338_v31, %v1313_v30 }
 0x5f2   :  { %v1246_v33 = vpop.f32.mrf.mxu1 }
 0x5f3   :  { %v1316_v35 = vadd.f32 %v1315_v59, %v1246_v33  ;;  %v1345_v39 = vmax.f32 %v1339_v34, 0.0 }
 0x5f4   :  { %v1866_v36 = vpop.f32.mrf.mxu1 }
 0x5f5   :  { %v1340_v37 = vadd.f32 %v1338_v31, %v1316_v35 }
 0x5f6   :  { %v1251_v38 = vpop.f32.mrf.mxu1 }
 0x5f7   :  { %v1346_v40 = vmax.f32 %v1340_v37, 0.0  ;;  %v1321_v41 = vadd.f32 %v1320_v18, %v1251_v38 }
 0x5f8   :  { %v1869_v42 = vpop.f32.mrf.mxu1 }
 0x5f9   :  { %v1351_v43 = vpack.c.bf16 %v1346_v40, %v1345_v39  ;;  %v1341_v45 = vadd.f32 %v1338_v31, %v1321_v41 }
 0x5fa   :  { %v1254_v44 = vpop.f32.mrf.mxu1 }
 0x5fb   :  { %v1324_v46 = vadd.f32 %v1323_v21, %v1254_v44  ;;  %1908 = vmatmul.mubr.bf16.vlgmr.msra.gmra.mxu0 %v1351_v43  ;;  %v1347_v50 = vmax.f32 %v1341_v45, 0.0 }
 0x5fc   :  { %v1870_v47 = vpop.f32.mrf.mxu1  ;;  %1911 = vmatprep.mubr.msk.bf16.mxu0 %vm1991_vm0, %v1990_v0 }
 0x5fd   :  { %v1342_v48 = vadd.f32 %v1338_v31, %v1324_v46 }
 0x5fe   :  { %v1259_v49 = vpop.f32.mrf.mxu1 }
 0x5ff   :  { %v1348_v51 = vmax.f32 %v1342_v48, 0.0  ;;  %v1329_v52 = vadd.f32 %v1328_v24, %v1259_v49 }
 0x600   :  { %v1873_v53 = vpop.f32.mrf.mxu1 }
 0x601   :  { %v1352_v54 = vpack.c.bf16 %v1348_v51, %v1347_v50  ;;  %v1343_v56 = vadd.f32 %v1338_v31, %v1329_v52 }
 0x602   :  { %v1262_v55 = vpop.f32.mrf.mxu1 }
 0x603   :  { %v1332_v57 = vadd.f32 %v1331_v26, %v1262_v55  ;;  %1912 = vmatmul.mubr.bf16.gmra.mxu0 %v1352_v54  ;;  %v1349_v60 = vmax.f32 %v1343_v56, 0.0 }
 0x604   :  { %v1874_v58 = vpop.f32.mrf.mxu1  ;;  %1915 = vmatprep.mubr.msk.bf16.mxu0 %vm1991_vm0, %v1990_v0 }
 0x605   :  { %v1344_v59 = vadd.f32 %v1338_v31, %v1332_v57 }
 0x607   :  { %v1350_v61 = vmax.f32 %v1344_v59, 0.0 }
 0x609   :  { %v1353_v62 = vpack.c.bf16 %v1350_v61, %v1349_v60 }
 0x60b   :  { %1916 = vmatmul.mubr.bf16.gmra.mxu0 %v1353_v62 }
 0x6bb   :  { %v1440_v1 = vpop.f32.mrf.mxu0 }
 0x6bc   :  { %v1441_v2 = vadd.f32 %v1440_v1, %v1357_v5 }
 0x6bd   :  { %v1909_v4 = vpop.f32.mrf.mxu0 }
 0x6be   :  { %1463 = vst [vmem:[%s2370_s6] sm:$0xff] %v1441_v2 }
 0x6bf   :  { %v1443_v6 = vpop.f32.mrf.mxu0 }
 0x6c0   :  { %v1444_v3 = vadd.f32 %v1443_v6, %v1357_v5 }
 0x6c1   :  { %v1910_v8 = vpop.f32.mrf.mxu0 }
 0x6c2   :  { %1464 = vst [vmem:[%s2370_s6 + $0x8] sm:$0xff] %v1444_v3 }
 0x6c3   :  { %v1448_v0 = vpop.f32.mrf.mxu0 }
 0x6c4   :  { %v1449_v9 = vadd.f32 %v1448_v0, %v1357_v5 }
 0x6c5   :  { %v1913_v11 = vpop.f32.mrf.mxu0 }
 0x6c6   :  { %1465 = vst [vmem:[%s2370_s6 + $0x10] sm:$0xff] %v1449_v9 }
 0x6c7   :  { %v1451_v10 = vpop.f32.mrf.mxu0 }
 0x6c8   :  { %v1452_v14 = vadd.f32 %v1451_v10, %v1357_v5 }
 0x6c9   :  { %v1914_v12 = vpop.f32.mrf.mxu0 }
 0x6ca   :  { %1466 = vst [vmem:[%s2370_s6 + $0x18] sm:$0xff] %v1452_v14 }
 0x6cb   :  { %v1456_v7 = vpop.f32.mrf.mxu0 }
 0x6cc   :  { %v1457_v13 = vadd.f32 %v1456_v7, %v1357_v5 }
 0x6cd   :  { %v1917_v15 = vpop.f32.mrf.mxu0 }
 0x6ce   :  { %1467 = vst [vmem:[%s2370_s6 + $0x20] sm:$0xff] %v1457_v13 }
 0x6cf   :  { %v1459_v16 = vpop.f32.mrf.mxu0 }
 0x6d0   :  { %v1460_v17 = vadd.f32 %v1459_v16, %v1357_v5 }
 0x6d1   :  { %v1918_v18 = vpop.f32.mrf.mxu0 }
 0x6d2   :  { %1468 = vst [vmem:[%s2370_s6 + $0x28] sm:$0xff] %v1460_v17 }

</bundles_post_ra>
